<compile_context>
chip_gen: v6e
topology: v6e:2x2x1
jax: 0.10.0
libtpu: 0.0.40
codegen_flags: <defaults>
</compile_context>

<pallas_src>
import functools

import jax
import jax.numpy as jnp
from jax.experimental import pallas as pl
from jax.experimental.pallas import tpu as pltpu

_MIB = 1024 * 1024


def _round_up(x, m):
    return (x + m - 1) // m * m


def _vmem_capacity_bytes():
    """Physical VMEM per core; conservative 64 MiB (v7x) fallback."""
    try:
        return int(pltpu.get_tpu_info().vmem_capacity_bytes)
    except Exception:  # pragma: no cover - info query not available
        return 64 * _MIB


def _clamp_vmem(est_bytes, cap):
    """Scoped VMEM limit: estimate + headroom, at least the 32 MiB default, <= physical."""
    return int(min(cap, max(32 * _MIB, est_bytes + 8 * _MIB)))


def _pick_tile_n(n_p, tile_n, min_tiles):
    """Largest tn that is a multiple of 128, divides n_p, is <= tile_n and yields
    at least `min_tiles` row tiles (falls back to 128 if impossible)."""
    m = n_p // 128
    best = 128
    for d in range(1, m + 1):
        if m % d != 0:
            continue
        tn = 128 * d
        if tn <= tile_n and (n_p // tn) >= min_tiles:
            best = tn
    return best


# ----------------------------------------------------------------------------
# Pass 1: support = x @ W   (one MXU pass per element, bf16 output)
# ----------------------------------------------------------------------------
def _support_kernel(x_ref, w_ref, out_ref):
    # x_ref: (tn, f_in_p) bf16, w_ref: (f_in_p, f_out_p) bf16 (resident).
    out_ref[...] = jnp.dot(
        x_ref[...], w_ref[...], preferred_element_type=jnp.float32
    ).astype(out_ref.dtype)


# ----------------------------------------------------------------------------
# Pass 2: out = adj @ support   (adj is the only N^2-scale HBM stream)
# ----------------------------------------------------------------------------
def _adj_support_kernel(adj_ref, sup_ref, out_ref, acc_ref, *, tn,
                        support_resident):
    # Grid = (batch b, output-row tile i, contraction tile k); k innermost.
    k = pl.program_id(2)

    @pl.when(k == 0)
    def _():
        acc_ref[...] = jnp.zeros_like(acc_ref)

    # int8 / bf16 adjacency tile -> bf16 for the MXU (cheap VPU convert,
    # hidden under the matmul).
    adj_tile = adj_ref[...].astype(jnp.bfloat16)

    if support_resident:
        # Whole per-batch support slab lives in VMEM; slice the k-th chunk.
        start = pl.multiple_of(k * tn, tn)
        sup = sup_ref[pl.ds(start, tn), :]
    else:
        sup = sup_ref[...]

    acc_ref[...] += jnp.dot(adj_tile, sup, preferred_element_type=jnp.float32)

    @pl.when(k == pl.num_programs(2) - 1)
    def _():
        out_ref[...] = acc_ref[...].astype(out_ref.dtype)


# ----------------------------------------------------------------------------
# Wrapper
# ----------------------------------------------------------------------------
def gcn_layer(x, adj, weight, *, tile_n=512, out_dtype=jnp.float32):
    """Pallas GCN layer.

    x:      [B, N, F_in]   (any float dtype; cast to bf16 for the MXU)
    adj:    [B, N, N]      bool / int -> stored int8 (exact 0/1);
                           float      -> stored bf16 (exact for 0/1, ~1e-2 rel.
                           tolerance for fractional normalized adjacencies)
    weight: [F_in, F_out]
    returns [B, N, F_out]  out_dtype (default float32, matching adj.float())
    """
    B, N, F_in = x.shape
    F_out = weight.shape[1]

    # ---- storage dtypes (accumulation stays f32 in-kernel) ------------------
    x = x.astype(jnp.bfloat16)
    weight = weight.astype(jnp.bfloat16)
    if adj.dtype == jnp.bool_ or jnp.issubdtype(adj.dtype, jnp.integer):
        adj = adj.astype(jnp.int8)      # exact for 0/1 adjacency, 1 byte/elem
    else:
        adj = adj.astype(jnp.bfloat16)  # mirrors adj.float(); exact for 0/1

    # ---- padding: bounded to < 128 per dim (no n_p = round_up(N, tn) blow-up)
    f_in_p = _round_up(F_in, 128)
    f_out_p = _round_up(F_out, 128)
    n_p = _round_up(N, 128)

    vmem_cap = _vmem_capacity_bytes()
    min_tiles = 2 if B == 1 else 1  # keep both v7x TensorCores busy when B == 1
    tn = _pick_tile_n(n_p, tile_n, min_tiles)

    if (n_p, f_in_p) != (N, F_in):
        x = jnp.pad(x, ((0, 0), (0, n_p - N), (0, f_in_p - F_in)))
    if n_p != N:
        adj = jnp.pad(adj, ((0, 0), (0, n_p - N), (0, n_p - N)))
    if (f_in_p, f_out_p) != (F_in, F_out):
        weight = jnp.pad(weight, ((0, f_in_p - F_in), (0, f_out_p - F_out)))

    # ---------------------------- pass 1: x @ W ------------------------------
    grid1 = (B, n_p // tn)
    flops1 = 2 * B * n_p * f_in_p * f_out_p
    bytes1 = x.size * 2 + weight.size * 2 + B * n_p * f_out_p * 2
    vmem1 = (2 * tn * f_in_p * 2          # x tiles (double-buffered)
             + 2 * f_in_p * f_out_p * 2   # resident weight (double-buffered)
             + 2 * tn * f_out_p * 2)      # support output tiles

    support = pl.pallas_call(
        _support_kernel,
        out_shape=jax.ShapeDtypeStruct((B, n_p, f_out_p), jnp.bfloat16),
        grid_spec=pltpu.PrefetchScalarGridSpec(
            num_scalar_prefetch=0,
            grid=grid1,
            in_specs=[
                pl.BlockSpec((None, tn, f_in_p), lambda b, i: (b, i, 0)),
                pl.BlockSpec((f_in_p, f_out_p), lambda b, i: (0, 0)),
            ],
            out_specs=pl.BlockSpec((None, tn, f_out_p), lambda b, i: (b, i, 0)),
        ),
        compiler_params=pltpu.CompilerParams(
            dimension_semantics=("parallel", "parallel"),
            vmem_limit_bytes=_clamp_vmem(vmem1, vmem_cap)),
        cost_estimate=pl.CostEstimate(
            flops=int(flops1), transcendentals=0, bytes_accessed=int(bytes1)),
    )(x, weight)

    # ------------------------- pass 2: adj @ support --------------------------
    support_bytes = n_p * f_out_p * 2
    # Resident per-batch support when a double-buffered copy stays well inside
    # VMEM (<= 1/4 of physical with double buffering).
    support_resident = support_bytes <= vmem_cap // 8

    if support_resident:
        sup_spec = pl.BlockSpec((None, n_p, f_out_p), lambda b, i, k: (b, 0, 0))
        sup_vmem = 2 * support_bytes
    else:
        sup_spec = pl.BlockSpec((None, tn, f_out_p), lambda b, i, k: (b, k, 0))
        sup_vmem = 2 * tn * f_out_p * 2

    out_itemsize = jnp.dtype(out_dtype).itemsize
    adj_itemsize = jnp.dtype(adj.dtype).itemsize
    vmem2 = (2 * tn * tn * adj_itemsize          # adj tiles (double-buffered)
             + sup_vmem                          # support
             + 2 * tn * f_out_p * out_itemsize   # output tiles
             + tn * f_out_p * 4)                 # f32 accumulator scratch

    grid2 = (B, n_p // tn, n_p // tn)
    flops2 = 2 * B * n_p * n_p * f_out_p
    bytes2 = (adj.size * adj_itemsize + B * support_bytes
              + B * n_p * f_out_p * out_itemsize)

    kernel2 = functools.partial(
        _adj_support_kernel, tn=tn, support_resident=support_resident)

    out = pl.pallas_call(
        kernel2,
        out_shape=jax.ShapeDtypeStruct((B, n_p, f_out_p), out_dtype),
        grid_spec=pltpu.PrefetchScalarGridSpec(
            num_scalar_prefetch=0,
            grid=grid2,
            in_specs=[
                pl.BlockSpec((None, tn, tn), lambda b, i, k: (b, i, k)),
                sup_spec,
            ],
            out_specs=pl.BlockSpec((None, tn, f_out_p), lambda b, i, k: (b, i, 0)),
            scratch_shapes=[pltpu.VMEM((tn, f_out_p), jnp.float32)],
        ),
        compiler_params=pltpu.CompilerParams(
            dimension_semantics=("parallel", "parallel", "arbitrary"),
            vmem_limit_bytes=_clamp_vmem(vmem2, vmem_cap)),
        cost_estimate=pl.CostEstimate(
            flops=int(flops2), transcendentals=0, bytes_accessed=int(bytes2)),
    )(adj, support)

    if (n_p, f_out_p) != (N, F_out):
        out = out[:, :N, :F_out]
    return out


def xavier_uniform(key, shape):
    fan_in, fan_out = shape
    bound = (6.0 / (fan_in + fan_out)) ** 0.5
    return jax.random.uniform(key, shape, jnp.float32, minval=-bound, maxval=bound)


if __name__ == "__main__":
    B, N, F_in, F_out = 2, 16, 32, 32

    key = jax.random.PRNGKey(0)
    k_w, k_x, k_a = jax.random.split(key, 3)

    # Deterministic parameter init (xavier_uniform, matching nn.init.xavier_uniform_).
    weight = xavier_uniform(k_w, (F_in, F_out))

    # Example inputs: node features and a sparse-ish 0/1 adjacency.
    x = jax.random.normal(k_x, (B, N, F_in), jnp.float32)
    adj_bool = jax.random.uniform(k_a, (B, N, N), jnp.float32) > 0.7
    adj_f32 = adj_bool.astype(jnp.float32)

    # Reference in plain f32 JAX (kernel uses bf16 MXU inputs + f32 accumulation,
    # so allow ~1% relative slack).
    ref = jnp.einsum("bnm,bmf->bnf", adj_f32,
                     jnp.einsum("bni,io->bno", x, weight))

    gcn = jax.jit(gcn_layer)

    # bool adjacency -> int8 HBM storage path.
    out_b = jax.block_until_ready(gcn(x, adj_bool, weight))
    # float adjacency (adj.float() in the PyTorch module) -> bf16 storage path.
    out_f = jax.block_until_ready(gcn(x, adj_f32, weight))

    assert out_b.shape == (B, N, F_out)
    assert out_f.shape == (B, N, F_out)
    for out in (out_b, out_f):
        assert jnp.allclose(out, ref, atol=5e-2, rtol=2e-2), (
            float(jnp.max(jnp.abs(out - ref))))

    print("KERNEL_OK")
</pallas_src>

<mosaic_0001>
module attributes {stable_mosaic.version = 11 : i64} {
  func.func @_support_kernel(%arg0: i32, %arg1: i32, %arg2: memref<1x128x128xbf16, #tpu.memory_space<vmem>>, %arg3: memref<128x128xbf16, #tpu.memory_space<vmem>>, %arg4: memref<1x128x128xbf16, #tpu.memory_space<vmem>>) attributes {dimension_semantics = [#tpu.dimension_semantics<parallel>, #tpu.dimension_semantics<parallel>], iteration_bounds = array<i64: 2, 1>, scalar_prefetch = 0 : i64, scratch_operands = 0 : i64, tpu.core_type = #tpu.core_type<tc>, window_params = [{transform_indices = @transform_0, window_bounds = array<i64: 1, 128, 128>}, {pipeline_mode = #tpu.pipeline_mode<synchronous>, transform_indices = @transform_1, window_bounds = array<i64: 128, 128>}, {transform_indices = @transform_2, window_bounds = array<i64: 1, 128, 128>}]} {
    %c0 = arith.constant 0 : index
    %c0_0 = arith.constant 0 : index
    %c0_1 = arith.constant 0 : index
    %0 = vector.load %arg2[%c0, %c0_0, %c0_1] : memref<1x128x128xbf16, #tpu.memory_space<vmem>>, vector<1x128x128xbf16>
    %1 = vector.shape_cast %0 : vector<1x128x128xbf16> to vector<128x128xbf16>
    %c0_2 = arith.constant 0 : index
    %c0_3 = arith.constant 0 : index
    %2 = vector.load %arg3[%c0_2, %c0_3] : memref<128x128xbf16, #tpu.memory_space<vmem>>, vector<128x128xbf16>
    %cst = arith.constant dense<0.000000e+00> : vector<128x128xf32>
    %3 = tpu.matmul %1, %2, %cst {dimension_numbers = #tpu.dot_dimension_numbers<[1], [0], [0], [1], [0, 0, 1, 1], [], []>} : vector<128x128xbf16>, vector<128x128xbf16>, vector<128x128xf32> -> vector<128x128xf32>
    %4 = arith.truncf %3 : vector<128x128xf32> to vector<128x128xbf16>
    %c0_4 = arith.constant 0 : index
    %c0_5 = arith.constant 0 : index
    %c0_6 = arith.constant 0 : index
    %5 = vector.load %arg4[%c0_4, %c0_5, %c0_6] : memref<1x128x128xbf16, #tpu.memory_space<vmem>>, vector<1x128x128xbf16>
    %6 = vector.shape_cast %5 : vector<1x128x128xbf16> to vector<128x128xbf16>
    %7 = vector.shape_cast %4 : vector<128x128xbf16> to vector<1x128x128xbf16>
    tpu.vector_store %arg4[%c0_4, %c0_5, %c0_6], %7 {strides = array<i32>} : memref<1x128x128xbf16, #tpu.memory_space<vmem>>, vector<1x128x128xbf16>,
    return
  }
  func.func @transform_0(%arg0: i32, %arg1: i32) -> (i32, i32, i32) {
    %c0_i32 = arith.constant 0 : i32
    %c0_i32_0 = arith.constant 0 : i32
    return %arg0, %arg1, %c0_i32 : i32, i32, i32
  }
  func.func @transform_1(%arg0: i32, %arg1: i32) -> (i32, i32) {
    %c0_i32 = arith.constant 0 : i32
    %c0_i32_0 = arith.constant 0 : i32
    %c0_i32_1 = arith.constant 0 : i32
    return %c0_i32, %c0_i32_0 : i32, i32
  }
  func.func @transform_2(%arg0: i32, %arg1: i32) -> (i32, i32, i32) {
    %c0_i32 = arith.constant 0 : i32
    %c0_i32_0 = arith.constant 0 : i32
    return %arg0, %arg1, %c0_i32 : i32, i32, i32
  }
}

module attributes {stable_mosaic.version = 11 : i64} {
  func.func @_adj_support_kernel(%arg0: i32, %arg1: i32, %arg2: i32, %arg3: memref<1x128x128xi8, #tpu.memory_space<vmem>>, %arg4: memref<1x128x128xbf16, #tpu.memory_space<vmem>>, %arg5: memref<1x128x128xf32, #tpu.memory_space<vmem>>, %arg6: memref<128x128xf32, #tpu.memory_space<vmem>>) attributes {dimension_semantics = [#tpu.dimension_semantics<parallel>, #tpu.dimension_semantics<parallel>, #tpu.dimension_semantics<arbitrary>], iteration_bounds = array<i64: 2, 1, 1>, scalar_prefetch = 0 : i64, scratch_operands = 1 : i64, tpu.core_type = #tpu.core_type<tc>, window_params = [{transform_indices = @transform_0, window_bounds = array<i64: 1, 128, 128>}, {transform_indices = @transform_1, window_bounds = array<i64: 1, 128, 128>}, {transform_indices = @transform_2, window_bounds = array<i64: 1, 128, 128>}]} {
    %c0_i32 = arith.constant 0 : i32
    %0 = arith.cmpi eq, %arg2, %c0_i32 : i32
    %1 = arith.extui %0 : i1 to i32
    %c0_i32_0 = arith.constant 0 : i32
    %2 = arith.cmpi ne, %1, %c0_i32_0 : i32
    scf.if %2 {
      %cst_11 = arith.constant 0.000000e+00 : f32
      %18 = vector.broadcast %cst_11 : f32 to vector<128x128xf32>
      %c0_12 = arith.constant 0 : index
      %c0_13 = arith.constant 0 : index
      %19 = vector.load %arg6[%c0_12, %c0_13] : memref<128x128xf32, #tpu.memory_space<vmem>>, vector<128x128xf32>
      tpu.vector_store %arg6[%c0_12, %c0_13], %18 {strides = array<i32>} : memref<128x128xf32, #tpu.memory_space<vmem>>, vector<128x128xf32>,
    } else {
    }
    %c0 = arith.constant 0 : index
    %c0_1 = arith.constant 0 : index
    %c0_2 = arith.constant 0 : index
    %3 = vector.load %arg3[%c0, %c0_1, %c0_2] : memref<1x128x128xi8, #tpu.memory_space<vmem>>, vector<1x128x128xi8>
    %4 = vector.shape_cast %3 : vector<1x128x128xi8> to vector<128x128xi8>
    %5 = arith.sitofp %4 : vector<128x128xi8> to vector<128x128xbf16>
    %c128_i32 = arith.constant 128 : i32
    %6 = arith.muli %arg2, %c128_i32 : i32
    %7 = tpu.assume_multiple %6, 128 : i32
    %c0_3 = arith.constant 0 : index
    %8 = arith.index_cast %7 : i32 to index
    %c0_4 = arith.constant 0 : index
    %9 = vector.load %arg4[%c0_3, %8, %c0_4] : memref<1x128x128xbf16, #tpu.memory_space<vmem>>, vector<1x128x128xbf16>
    %10 = vector.shape_cast %9 : vector<1x128x128xbf16> to vector<128x128xbf16>
    %c0_5 = arith.constant 0 : index
    %c0_6 = arith.constant 0 : index
    %11 = vector.load %arg6[%c0_5, %c0_6] : memref<128x128xf32, #tpu.memory_space<vmem>>, vector<128x128xf32>
    %cst = arith.constant dense<0.000000e+00> : vector<128x128xf32>
    %12 = tpu.matmul %5, %10, %cst {dimension_numbers = #tpu.dot_dimension_numbers<[1], [0], [0], [1], [0, 0, 1, 1], [], []>} : vector<128x128xbf16>, vector<128x128xbf16>, vector<128x128xf32> -> vector<128x128xf32>
    %13 = arith.addf %11, %12 : vector<128x128xf32>
    %c0_7 = arith.constant 0 : index
    %c0_8 = arith.constant 0 : index
    %14 = vector.load %arg6[%c0_7, %c0_8] : memref<128x128xf32, #tpu.memory_space<vmem>>, vector<128x128xf32>
    tpu.vector_store %arg6[%c0_7, %c0_8], %13 {strides = array<i32>} : memref<128x128xf32, #tpu.memory_space<vmem>>, vector<128x128xf32>,
    %c0_i32_9 = arith.constant 0 : i32
    %15 = arith.cmpi eq, %arg2, %c0_i32_9 : i32
    %16 = arith.extui %15 : i1 to i32
    %c0_i32_10 = arith.constant 0 : i32
    %17 = arith.cmpi ne, %16, %c0_i32_10 : i32
    scf.if %17 {
      %c0_11 = arith.constant 0 : index
      %c0_12 = arith.constant 0 : index
      %18 = vector.load %arg6[%c0_11, %c0_12] : memref<128x128xf32, #tpu.memory_space<vmem>>, vector<128x128xf32>
      %c0_13 = arith.constant 0 : index
      %c0_14 = arith.constant 0 : index
      %c0_15 = arith.constant 0 : index
      %19 = vector.load %arg5[%c0_13, %c0_14, %c0_15] : memref<1x128x128xf32, #tpu.memory_space<vmem>>, vector<1x128x128xf32>
      %20 = vector.shape_cast %19 : vector<1x128x128xf32> to vector<128x128xf32>
      %21 = vector.shape_cast %18 : vector<128x128xf32> to vector<1x128x128xf32>
      tpu.vector_store %arg5[%c0_13, %c0_14, %c0_15], %21 {strides = array<i32>} : memref<1x128x128xf32, #tpu.memory_space<vmem>>, vector<1x128x128xf32>,
    } else {
    }
    return
  }
  func.func @transform_0(%arg0: i32, %arg1: i32, %arg2: i32) -> (i32, i32, i32) {
    %c0_i32 = arith.constant 0 : i32
    return %arg0, %arg1, %arg2 : i32, i32, i32
  }
  func.func @transform_1(%arg0: i32, %arg1: i32, %arg2: i32) -> (i32, i32, i32) {
    %c0_i32 = arith.constant 0 : i32
    %c0_i32_0 = arith.constant 0 : i32
    %c0_i32_1 = arith.constant 0 : i32
    return %arg0, %c0_i32, %c0_i32_0 : i32, i32, i32
  }
  func.func @transform_2(%arg0: i32, %arg1: i32, %arg2: i32) -> (i32, i32, i32) {
    %c0_i32 = arith.constant 0 : i32
    %c0_i32_0 = arith.constant 0 : i32
    return %arg0, %arg1, %c0_i32 : i32, i32, i32
  }
}

</mosaic_0001>

<bundles_post_ra>
// kernel: gcn_layer.2
= control target key start
LH: loop header
LB: loop body
LE: loop exit
PB: predicated region body
PF: predicated region fallthrough
CT: control target
= control target key end

     0   :  { %s827_s9 = smov 0   ;;  %s829_s10 = smov 0   ;;  %s901_s0 = inlined_call_operand.vmem [shape: bf16[2,128,128], index: 0, kind: input, shape index: {}]   ;;  %s902_s1 = inlined_call_operand.vmem [shape: bf16[128,128], index: 1, kind: input, shape index: {}]   ;;  %s903_s2 = inlined_call_operand.vmem [shape: bf16[2,128,128], index: 2, kind: output, shape index: {}]  }
   0x1   :  { %s831_s11 = smov 0  }
   0x2 LB: > { %s24_s12 = sadd.s32 1, %s806_s10  ;;  %p580_p0 = scmp.ge.s32.totalorder %s810_s11, 1  ;;  %s810_s11 = sphi %s831_s11, %s12_s11   ;;  %s806_s10 = sphi %s829_s10, %s905_s10   ;;  %s802_s9 = sphi %s827_s9, %s904_s9  }
   0x3   : > { %p26_p1 = scmp.ge.s32.totalorder %s24_s12, 2  ;;  %p133_p2 = scmp.lt.s32.totalorder %s810_s11, 3 }
   0x5   : > { %s907_s12 = smov (%p26_p1, %s24_s12), 0  ;;  %p134_p3 = pnand %p580_p0, %p133_p2 }
   0x6   : > { %p164_p4 = scmp.lt.s32.totalorder (!%p134_p3), %s802_s9, 1 }
   0x7   : > { %137 = sbr.rel (%p134_p3) target bundleno = 255 (0xff), region = 28 }
   0xc   : > { %v772_v0 = vld [vmem:[%s902_s1 + $0x38] sm:$0xff]   ;;  %v773_v1 = vld [vmem:[%s902_s1 + $0x30] sm:$0xff]   ;;  %s909_s9 = smov (!%p164_p4, %s802_s9), 1  ;;  %v774_v2 = vld [vmem:[%s902_s1 + $0x28] sm:$0xff]  }
   0xd   : > { %700 = vmatprep.subr.bf16.mxu0 %v772_v0  ;;  %732 = vmatprep.subr.bf16.mxu1 %v772_v0  ;;  %s619_s19 = sshll.u32 %s909_s9, 6  ;;  %v775_v3 = vld [vmem:[%s902_s1 + $0x20] sm:$0xff]   ;;  %v776_v6 = vld [vmem:[%s902_s1 + $0x18] sm:$0xff]   ;;  %v777_v7 = vld [vmem:[%s902_s1 + $0x10] sm:$0xff]  }
   0xe   : > { %701 = vmatpush3.bf16.msra.mxu0 %v772_v0  ;;  %740 = vmatpush3.bf16.msra.mxu1 %v772_v0  ;;  %s862_s22 = scalar_lea.vmem %s901_s0, %s619_s19  ;;  %v778_v8 = vld [vmem:[%s902_s1 + $0x8] sm:$0xff]   ;;  %v779_v9 = vld [vmem:[%s902_s1] sm:$0xff]   ;;  %s181_s7 = scalar_lea.vmem %s903_s2, %s619_s19 }
   0xf   : > { %702 = vmatprep.subr.bf16.mxu0 %v773_v1  ;;  %733 = vmatprep.subr.bf16.mxu1 %v773_v1  ;;  %v780_v4 = vld [vmem:[%s862_s22] sm:$0xff]   ;;  %v782_v10 = vld [vmem:[%s862_s22 + $0x8] sm:$0xff]   ;;  %v784_v12 = vld [vmem:[%s862_s22 + $0x10] sm:$0xff]  }
  0x10   : > { %v781_v5 = vld [vmem:[%s862_s22 + $0x20] sm:$0xff]   ;;  %716 = vmatprep.mubr.bf16.mxu0 %v780_v4  ;;  %v783_v11 = vld [vmem:[%s862_s22 + $0x28] sm:$0xff]   ;;  %v785_v13 = vld [vmem:[%s862_s22 + $0x30] sm:$0xff]  }
  0x11   : > { %724 = vmatprep.mubr.bf16.mxu1 %v781_v5  ;;  %v786_v14 = vld [vmem:[%s862_s22 + $0x18] sm:$0xff]  }
  0x12   : > { %703 = vmatpush3.bf16.msra.mxu0 %v773_v1  ;;  %741 = vmatpush3.bf16.msra.mxu1 %v773_v1  ;;  %v787_v15 = vld [vmem:[%s862_s22 + $0x38] sm:$0xff]  }
  0x13   : > { %704 = vmatprep.subr.bf16.mxu0 %v774_v2  ;;  %734 = vmatprep.subr.bf16.mxu1 %v774_v2 }
  0x16   : > { %705 = vmatpush3.bf16.msra.mxu0 %v774_v2  ;;  %742 = vmatpush3.bf16.msra.mxu1 %v774_v2 }
  0x17   : > { %706 = vmatprep.subr.bf16.mxu0 %v775_v3  ;;  %735 = vmatprep.subr.bf16.mxu1 %v775_v3 }
  0x1a   : > { %707 = vmatpush3.bf16.msra.mxu0 %v775_v3  ;;  %743 = vmatpush3.bf16.msra.mxu1 %v775_v3 }
  0x1b   : > { %708 = vmatprep.subr.bf16.mxu0 %v776_v6  ;;  %736 = vmatprep.subr.bf16.mxu1 %v776_v6 }
  0x1e   : > { %709 = vmatpush3.bf16.msra.mxu0 %v776_v6  ;;  %744 = vmatpush3.bf16.msra.mxu1 %v776_v6 }
  0x1f   : > { %710 = vmatprep.subr.bf16.mxu0 %v777_v7  ;;  %737 = vmatprep.subr.bf16.mxu1 %v777_v7 }
  0x22   : > { %711 = vmatpush3.bf16.msra.mxu0 %v777_v7  ;;  %745 = vmatpush3.bf16.msra.mxu1 %v777_v7 }
  0x23   : > { %712 = vmatprep.subr.bf16.mxu0 %v778_v8  ;;  %738 = vmatprep.subr.bf16.mxu1 %v778_v8 }
  0x26   : > { %713 = vmatpush3.bf16.msra.mxu0 %v778_v8  ;;  %746 = vmatpush3.bf16.msra.mxu1 %v778_v8 }
  0x27   : > { %714 = vmatprep.subr.bf16.mxu0 %v779_v9  ;;  %739 = vmatprep.subr.bf16.mxu1 %v779_v9 }
  0x2a   : > { %715 = vmatpush3.bf16.msra.mxu0 %v779_v9  ;;  %747 = vmatpush3.bf16.msra.mxu1 %v779_v9 }
  0x2d   : > { %717 = vmatmul.mubr.bf16.vlgmr.msra.gmra.mxu0 %v782_v10  ;;  %725 = vmatmul.mubr.bf16.vlgmr.msra.gmra.mxu1 %v783_v11 }
  0x2e   : > { %720 = vmatprep.mubr.bf16.mxu0 %v784_v12  ;;  %728 = vmatprep.mubr.bf16.mxu1 %v785_v13 }
  0x35   : > { %721 = vmatmul.mubr.bf16.gmra.mxu0 %v786_v14  ;;  %729 = vmatmul.mubr.bf16.gmra.mxu1 %v787_v15 }
  0xed   : > { %v718_v16 = vpop.f32.mrf.mxu0  ;;  %v726_v17 = vpop.f32.mrf.mxu1 }
  0xef   : > { %v346_v18 = vpop.f32.mrf.mxu0  ;;  %v378_v19 = vpop.f32.mrf.mxu1 }
  0xf1   : > { %v719_v20 = vpop.f32.mrf.mxu0  ;;  %v727_v21 = vpop.f32.mrf.mxu1 }
  0xf2   : > { %v645_v22 = vpack.c.bf16 %v719_v20, %v718_v16  ;;  %v665_v23 = vpack.c.bf16 %v727_v21, %v726_v17 }
  0xf3   : > { %v349_v24 = vpop.f32.mrf.mxu0  ;;  %v381_v25 = vpop.f32.mrf.mxu1 }
  0xf4   : > { %677 = vst [vmem:[%s181_s7 + $0x8] sm:$0xff] %v645_v22   ;;  %681 = vst [vmem:[%s181_s7 + $0x28] sm:$0xff] %v665_v23   ;;  %v640_v26 = vpack.c.bf16 %v349_v24, %v346_v18  ;;  %v660_v27 = vpack.c.bf16 %v381_v25, %v378_v19 }
  0xf5   : > { %v722_v28 = vpop.f32.mrf.mxu0  ;;  %v730_v29 = vpop.f32.mrf.mxu1 }
  0xf6   : > { %641 = vst [vmem:[%s181_s7] sm:$0xff] %v640_v26   ;;  %680 = vst [vmem:[%s181_s7 + $0x20] sm:$0xff] %v660_v27  }
  0xf7   : > { %v362_v30 = vpop.f32.mrf.mxu0  ;;  %v394_v31 = vpop.f32.mrf.mxu1 }
  0xf9   : > { %v723_v32 = vpop.f32.mrf.mxu0  ;;  %v731_v33 = vpop.f32.mrf.mxu1 }
  0xfa   : > { %v655_v34 = vpack.c.bf16 %v723_v32, %v722_v28  ;;  %v675_v35 = vpack.c.bf16 %v731_v33, %v730_v29 }
  0xfb   : > { %v365_v36 = vpop.f32.mrf.mxu0  ;;  %v397_v37 = vpop.f32.mrf.mxu1 }
  0xfc   : > { %679 = vst [vmem:[%s181_s7 + $0x18] sm:$0xff] %v655_v34   ;;  %683 = vst [vmem:[%s181_s7 + $0x38] sm:$0xff] %v675_v35   ;;  %v650_v38 = vpack.c.bf16 %v365_v36, %v362_v30  ;;  %v670_v39 = vpack.c.bf16 %v397_v37, %v394_v31 }
  0xfe   : > { %678 = vst [vmem:[%s181_s7 + $0x10] sm:$0xff] %v650_v38   ;;  %682 = vst [vmem:[%s181_s7 + $0x30] sm:$0xff] %v670_v39  }
  0xff PF: > { %s12_s11 = sadd.s32 1, %s810_s11   ;;  %s904_s9 = smov %s806_s10 }
 0x100   : > { %p9_p5 = scmp.ge.s32.totalorder %s12_s11, 4   ;;  %s905_s10 = smov %s907_s12 }
 0x102   :  { %11 = sbr.rel (!%p9_p5) target bundleno = 2 (0x2), region = 58 }

// kernel: gcn_layer.3
= control target key start
LH: loop header
LB: loop body
LE: loop exit
PB: predicated region body
PF: predicated region fallthrough
CT: control target
= control target key end

     0   :  { %s769_s9 = smov 0   ;;  %s771_s10 = smov 0   ;;  %s844_s0 = inlined_call_operand.vmem [shape: s8[2,128,128], index: 0, kind: input, shape index: {}]   ;;  %s845_s1 = inlined_call_operand.vmem [shape: bf16[2,128,128], index: 1, kind: input, shape index: {}]   ;;  %s846_s2 = inlined_call_operand.vmem [shape: f32[2,128,128], index: 2, kind: output, shape index: {}]  }
   0x1   :  { %s773_s11 = smov 0  }
   0x2 LB: > { %s31_s12 = sadd.s32 1, %s748_s10  ;;  %p614_p0 = scmp.ge.s32.totalorder %s752_s11, 1  ;;  %s752_s11 = sphi %s773_s11, %s12_s11   ;;  %s748_s10 = sphi %s771_s10, %s848_s10   ;;  %s744_s9 = sphi %s769_s9, %s847_s9  }
   0x3   : > { %p33_p1 = scmp.ge.s32.totalorder %s31_s12, 2  ;;  %p155_p2 = scmp.lt.s32.totalorder %s752_s11, 3 }
   0x5   : > { %s850_s12 = smov (%p33_p1, %s31_s12), 0  ;;  %p156_p3 = pnand %p614_p0, %p155_p2 }
   0x6   : > { %p194_p4 = scmp.lt.s32.totalorder (!%p156_p3), %s744_s9, 1 }
   0x7   : > { %159 = sbr.rel (%p156_p3) target bundleno = 256 (0x100), region = 28 }
   0xc   : > { %s852_s9 = smov (!%p194_p4, %s744_s9), 1 }
   0xd   : > { %s632_s13 = sshll.u32 %s852_s9, 6  ;;  %s631_s17 = sshll.u32 %s852_s9, 5 }
   0xe   : > { %s793_s16 = scalar_lea.vmem %s845_s1, %s632_s13  ;;  %s802_s20 = scalar_lea.vmem %s844_s0, %s631_s17 }
   0xf   : > { %v722_v0 = vld [vmem:[%s793_s16 + $0x38] sm:$0xff]   ;;  %v723_v1 = vld [vmem:[%s793_s16 + $0x30] sm:$0xff]   ;;  %v724_v2 = vld [vmem:[%s793_s16 + $0x28] sm:$0xff]   ;;  %s633_s21 = sshll.u32 %s852_s9, 7 }
  0x10   : > { %650 = vmatprep.subr.bf16.mxu0 %v722_v0  ;;  %682 = vmatprep.subr.bf16.mxu1 %v722_v0  ;;  %v725_v3 = vld [vmem:[%s793_s16 + $0x20] sm:$0xff]   ;;  %v244_v5 = vld [vmem:[%s802_s20 + $0x10] sm:$0xff]  ;;  %v726_v8 = vld [vmem:[%s793_s16 + $0x18] sm:$0xff]   ;;  %s817_s24 = scalar_lea.vmem %s846_s2, %s633_s21 }
  0x11   : > { %651 = vmatpush3.bf16.msra.mxu0 %v722_v0  ;;  %690 = vmatpush3.bf16.msra.mxu1 %v722_v0  ;;  %v242_v4 = vld [vmem:[%s802_s20] sm:$0xff]  ;;  %v250_v7 = vunpack.c.l.s8.bf16 %v244_v5  ;;  %v727_v9 = vld [vmem:[%s793_s16 + $0x10] sm:$0xff]   ;;  %v728_v10 = vld [vmem:[%s793_s16 + $0x8] sm:$0xff]   ;;  %v251_v15 = vunpack.c.h.s8.bf16 %v244_v5 }
  0x12   : > { %652 = vmatprep.subr.bf16.mxu0 %v723_v1  ;;  %683 = vmatprep.subr.bf16.mxu1 %v723_v1  ;;  %v246_v6 = vunpack.c.l.s8.bf16 %v242_v4  ;;  %v729_v11 = vld [vmem:[%s793_s16] sm:$0xff]   ;;  %v243_v12 = vld [vmem:[%s802_s20 + $0x8] sm:$0xff]  ;;  %v245_v13 = vld [vmem:[%s802_s20 + $0x18] sm:$0xff]  ;;  %v247_v14 = vunpack.c.h.s8.bf16 %v242_v4 }
  0x13   : > { %674 = vmatprep.mubr.bf16.mxu1 %v250_v7  ;;  %v248_v16 = vunpack.c.l.s8.bf16 %v243_v12  ;;  %v252_v17 = vunpack.c.l.s8.bf16 %v245_v13  ;;  %v249_v18 = vunpack.c.h.s8.bf16 %v243_v12  ;;  %v253_v19 = vunpack.c.h.s8.bf16 %v245_v13 }
  0x14   : > { %666 = vmatprep.mubr.bf16.mxu0 %v246_v6 }
  0x15   : > { %653 = vmatpush3.bf16.msra.mxu0 %v723_v1  ;;  %691 = vmatpush3.bf16.msra.mxu1 %v723_v1 }
  0x16   : > { %654 = vmatprep.subr.bf16.mxu0 %v724_v2  ;;  %684 = vmatprep.subr.bf16.mxu1 %v724_v2 }
  0x19   : > { %655 = vmatpush3.bf16.msra.mxu0 %v724_v2  ;;  %692 = vmatpush3.bf16.msra.mxu1 %v724_v2 }
  0x1a   : > { %656 = vmatprep.subr.bf16.mxu0 %v725_v3  ;;  %685 = vmatprep.subr.bf16.mxu1 %v725_v3 }
  0x1d   : > { %657 = vmatpush3.bf16.msra.mxu0 %v725_v3  ;;  %693 = vmatpush3.bf16.msra.mxu1 %v725_v3 }
  0x1e   : > { %658 = vmatprep.subr.bf16.mxu0 %v726_v8  ;;  %686 = vmatprep.subr.bf16.mxu1 %v726_v8 }
  0x21   : > { %659 = vmatpush3.bf16.msra.mxu0 %v726_v8  ;;  %694 = vmatpush3.bf16.msra.mxu1 %v726_v8 }
  0x22   : > { %660 = vmatprep.subr.bf16.mxu0 %v727_v9  ;;  %687 = vmatprep.subr.bf16.mxu1 %v727_v9 }
  0x25   : > { %661 = vmatpush3.bf16.msra.mxu0 %v727_v9  ;;  %695 = vmatpush3.bf16.msra.mxu1 %v727_v9 }
  0x26   : > { %662 = vmatprep.subr.bf16.mxu0 %v728_v10  ;;  %688 = vmatprep.subr.bf16.mxu1 %v728_v10 }
  0x29   : > { %663 = vmatpush3.bf16.msra.mxu0 %v728_v10  ;;  %696 = vmatpush3.bf16.msra.mxu1 %v728_v10 }
  0x2a   : > { %664 = vmatprep.subr.bf16.mxu0 %v729_v11  ;;  %689 = vmatprep.subr.bf16.mxu1 %v729_v11 }
  0x2d   : > { %665 = vmatpush3.bf16.msra.mxu0 %v729_v11  ;;  %697 = vmatpush3.bf16.msra.mxu1 %v729_v11 }
  0x30   : > { %667 = vmatmul.mubr.bf16.vlgmr.msra.gmra.mxu0 %v247_v14  ;;  %675 = vmatmul.mubr.bf16.vlgmr.msra.gmra.mxu1 %v251_v15 }
  0x31   : > { %670 = vmatprep.mubr.bf16.mxu0 %v248_v16  ;;  %678 = vmatprep.mubr.bf16.mxu1 %v252_v17 }
  0x38   : > { %671 = vmatmul.mubr.bf16.gmra.mxu0 %v249_v18  ;;  %679 = vmatmul.mubr.bf16.gmra.mxu1 %v253_v19 }
  0xf0   : > { %v668_v20 = vpop.f32.mrf.mxu0  ;;  %v676_v21 = vpop.f32.mrf.mxu1 }
  0xf1   : > { %489 = vst [vmem:[%s817_s24 + $0x10] sm:$0xff] %v668_v20  ;;  %497 = vst [vmem:[%s817_s24 + $0x50] sm:$0xff] %v676_v21 }
  0xf2   : > { %v373_v22 = vpop.f32.mrf.mxu0  ;;  %v405_v23 = vpop.f32.mrf.mxu1 }
  0xf3   : > { %487 = vst [vmem:[%s817_s24] sm:$0xff] %v373_v22  ;;  %495 = vst [vmem:[%s817_s24 + $0x40] sm:$0xff] %v405_v23 }
  0xf4   : > { %v669_v24 = vpop.f32.mrf.mxu0  ;;  %v677_v25 = vpop.f32.mrf.mxu1 }
  0xf5   : > { %490 = vst [vmem:[%s817_s24 + $0x18] sm:$0xff] %v669_v24  ;;  %498 = vst [vmem:[%s817_s24 + $0x58] sm:$0xff] %v677_v25 }
  0xf6   : > { %v376_v26 = vpop.f32.mrf.mxu0  ;;  %v408_v27 = vpop.f32.mrf.mxu1 }
  0xf7   : > { %488 = vst [vmem:[%s817_s24 + $0x8] sm:$0xff] %v376_v26  ;;  %496 = vst [vmem:[%s817_s24 + $0x48] sm:$0xff] %v408_v27 }
  0xf8   : > { %v672_v28 = vpop.f32.mrf.mxu0  ;;  %v680_v29 = vpop.f32.mrf.mxu1 }
  0xf9   : > { %493 = vst [vmem:[%s817_s24 + $0x30] sm:$0xff] %v672_v28  ;;  %501 = vst [vmem:[%s817_s24 + $0x70] sm:$0xff] %v680_v29 }
  0xfa   : > { %v389_v30 = vpop.f32.mrf.mxu0  ;;  %v421_v31 = vpop.f32.mrf.mxu1 }
  0xfb   : > { %491 = vst [vmem:[%s817_s24 + $0x20] sm:$0xff] %v389_v30  ;;  %499 = vst [vmem:[%s817_s24 + $0x60] sm:$0xff] %v421_v31 }
  0xfc   : > { %v673_v32 = vpop.f32.mrf.mxu0  ;;  %v681_v33 = vpop.f32.mrf.mxu1 }
  0xfd   : > { %494 = vst [vmem:[%s817_s24 + $0x38] sm:$0xff] %v673_v32  ;;  %502 = vst [vmem:[%s817_s24 + $0x78] sm:$0xff] %v681_v33 }
  0xfe   : > { %v392_v34 = vpop.f32.mrf.mxu0  ;;  %v424_v35 = vpop.f32.mrf.mxu1 }
  0xff   : > { %492 = vst [vmem:[%s817_s24 + $0x28] sm:$0xff] %v392_v34  ;;  %500 = vst [vmem:[%s817_s24 + $0x68] sm:$0xff] %v424_v35 }
 0x100 PF: > { %s12_s11 = sadd.s32 1, %s752_s11   ;;  %s847_s9 = smov %s748_s10 }
 0x101   : > { %p9_p5 = scmp.ge.s32.totalorder %s12_s11, 4   ;;  %s848_s10 = smov %s850_s12 }
 0x103   :  { %11 = sbr.rel (!%p9_p5) target bundleno = 2 (0x2), region = 70 }

</bundles_post_ra>
